<compile_context>
chip_gen: v6e
topology: v6e:2x2x1
jax: 0.10.0
libtpu: 0.0.40
codegen_flags: <defaults>
</compile_context>

<pallas_src>
import functools

import jax
import jax.numpy as jnp
from jax.experimental import pallas as pl
from jax.experimental.pallas import tpu as pltpu


def _newton_reciprocal(x):
    """EUP approx reciprocal refined with two Newton-Raphson steps (f32-exact)."""
    inv = pl.reciprocal(x, approx=True)
    inv = inv * (2.0 - x * inv)
    inv = inv * (2.0 - x * inv)
    return inv


def _softadapt_kernel(step_ref, losses_ref, prev_ref,
                      loss_ref, lmbda_ref, new_prev_ref,
                      *, num_losses: int, eps: float, weights: tuple):
    """Inputs : step (1,) i32 SMEM, losses (n,) f32 SMEM, prev (1,P) f32 VMEM.
    Outputs: loss (1,1), lmbda (1,P), new_prev (1,P)  [new_prev aliases prev]."""
    P = prev_ref.shape[-1]
    step = step_ref[0]

    # Load prev fully into registers BEFORE any store: prev's HBM buffer is
    # aliased to new_prev's, so keep every read of prev ahead of the writeback.
    prev = prev_ref[...]                                    # (1, P) full-tile load

    lane = jax.lax.broadcasted_iota(jnp.int32, (1, P), 1)
    valid = lane < num_losses                               # real (un-padded) slots

    # Weighted current losses built from SMEM scalars; static weights are
    # compile-time constants.  Padded lanes stay exactly 0.
    wl = jnp.zeros((1, P), jnp.float32)
    for i in range(num_losses):
        wl = jnp.where(lane == i, losses_ref[i] * weights[i], wl)

    @pl.when(step == 0)
    def _():
        # step 0: equal-weight sum, lmbda = ones on valid lanes.
        loss_ref[...] = jnp.sum(wl, axis=-1, keepdims=True)         # (1, 1)
        lmbda_ref[...] = valid.astype(jnp.float32)

    @pl.when(step != 0)
    def _():
        # normalizer = max_i(wl_i / prev_i)   (no eps here -> matches reference)
        ratio = jnp.where(valid, wl / prev, -jnp.inf)                # mask padded 0/0
        normalizer = jnp.max(ratio)
        inv_prev = _newton_reciprocal(prev + eps)                    # EUP, not VALU divide
        lmbda = jnp.exp(wl * inv_prev - normalizer)                  # (1, P)
        lmbda = jnp.where(valid, lmbda, 0.0)                         # zero padded lanes
        lmbda_ref[...] = lmbda
        # One fused XLU reduce for both sums: rows = [lmbda, lmbda * wl].
        both = jnp.concatenate([lmbda, lmbda * wl], axis=0)          # (2, P)
        sums = jnp.sum(both, axis=-1, keepdims=True)                 # (2, 1)
        lmbda_sum = sums[0:1, :]                                     # (1, 1)
        raw = sums[1:2, :]                                           # (1, 1)
        inv_den = _newton_reciprocal(lmbda_sum + eps)
        loss_ref[...] = raw * (float(num_losses) * inv_den)          # (1, 1)

    # prev_losses <- weighted current losses (after all reads of `prev`).
    new_prev_ref[...] = wl


class SoftAdaptPallas:
    """JAX/Pallas port of neuralop.losses.meta_losses.SoftAdapt (forward only).

    Functional core: ``apply(losses, prev_padded, step) -> (loss, lmbda, new_prev)``
    (pure, jitted, state threaded explicitly; safe to call from inside an outer
    training jit).  ``forward(losses, step)`` is a thin stateful convenience
    mirroring the torch register_buffer behaviour.
    """

    def __init__(self, num_losses: int, eps: float = 1e-8, weights=None,
                 loss_keys=None):
        self.num_losses = int(num_losses)
        self.eps = float(eps)
        self.loss_keys = list(loss_keys) if loss_keys is not None else None
        n = self.num_losses
        P = max(128, ((n + 127) // 128) * 128)   # lane-dense padded width
        self._padded = P

        # Static weights (default 1.0 for missing keys / weights=None), baked
        # into the kernel as closure constants.
        if weights is None or self.loss_keys is None:
            w_list = [1.0] * n
        else:
            w_list = [float(weights.get(k, 1.0)) for k in self.loss_keys]
        self.static_weights = jnp.asarray(w_list, dtype=jnp.float32)

        # prev_losses buffer (padded), analogue of register_buffer('prev_losses').
        self._prev_padded = jnp.zeros((1, P), jnp.float32)

        kernel = functools.partial(_softadapt_kernel, num_losses=n,
                                   eps=self.eps, weights=tuple(w_list))
        pallas_fn = pl.pallas_call(
            kernel,
            out_shape=(
                jax.ShapeDtypeStruct((1, 1), jnp.float32),   # loss (scalar tile)
                jax.ShapeDtypeStruct((1, P), jnp.float32),   # lmbda
                jax.ShapeDtypeStruct((1, P), jnp.float32),   # new prev_losses
            ),
            in_specs=[
                pl.BlockSpec(memory_space=pltpu.SMEM),       # step   (1,)  int32
                pl.BlockSpec(memory_space=pltpu.SMEM),       # losses (n,)  f32
                pl.BlockSpec((1, P), lambda: (0, 0)),        # prev   (1,P) VMEM
            ],
            out_specs=(
                pl.BlockSpec((1, 1), lambda: (0, 0)),
                pl.BlockSpec((1, P), lambda: (0, 0)),
                pl.BlockSpec((1, P), lambda: (0, 0)),
            ),
            input_output_aliases={2: 2},                     # prev updated in place
            cost_estimate=pl.CostEstimate(flops=32 * P, transcendentals=3 * P,
                                          bytes_accessed=8 * P + 4 * (n + 2)),
        )

        def fwd(losses, prev_padded, step):
            # losses: tuple/list of scalars (dict values) or a (n,)-vector.
            if isinstance(losses, (tuple, list)):
                vec = jnp.stack([jnp.asarray(l, jnp.float32).reshape(())
                                 for l in losses])
            else:
                vec = jnp.asarray(losses, jnp.float32).reshape(-1)
            step_arr = jnp.asarray(step, jnp.int32).reshape((1,))
            loss_tile, lmbda_row, new_prev = pallas_fn(step_arr, vec, prev_padded)
            return loss_tile[0, 0], lmbda_row[0, :n], new_prev

        # Single dispatch per training step; prev state threaded functionally.
        self.apply = jax.jit(fwd)

    @property
    def prev_losses(self):
        return self._prev_padded[0, :self.num_losses]

    def forward(self, losses, step):
        """losses: dict[str, scalar] (or tuple / 1D array of length num_losses)."""
        if isinstance(losses, dict):
            keys = self.loss_keys if self.loss_keys is not None else list(losses.keys())
            losses_in = tuple(losses[k] for k in keys)
        else:
            losses_in = losses
        loss, lmbda, new_prev = self.apply(losses_in, self._prev_padded, step)
        self._prev_padded = new_prev   # stateful buffer update (torch-style)
        return loss, lmbda

    __call__ = forward


def _reference_softadapt(losses_vec, prev, step, num_losses, eps, static_w):
    """Pure-JAX reference mirroring the PyTorch forward exactly."""
    l = losses_vec * static_w
    if step == 0:
        return jnp.sum(l), jnp.ones_like(l), l
    normalizer = jnp.max(l / prev)
    lmbda = jnp.exp(l / (prev + eps) - normalizer)
    lmbda_sum = jnp.sum(lmbda)
    loss = jnp.sum(lmbda * l) * (num_losses / (lmbda_sum + eps))
    return loss, lmbda, l


if __name__ == "__main__":
    num_losses = 4
    keys = [f"loss_{i}" for i in range(num_losses)]

    agg = SoftAdaptPallas(num_losses=num_losses, eps=1e-8,
                          weights={"loss_0": 2.0}, loss_keys=keys)

    key = jax.random.PRNGKey(0)
    k0, k1 = jax.random.split(key)
    # Two "training steps" worth of positive scalar losses.
    losses_step0 = jnp.abs(jax.random.normal(k0, (num_losses,), dtype=jnp.float32)) + 0.1
    losses_step1 = jnp.abs(jax.random.normal(k1, (num_losses,), dtype=jnp.float32)) + 0.1

    # --- step 0: equal-weight sum, prev_losses initialized ---
    loss0, lmbda0 = agg.forward({k: losses_step0[i] for i, k in enumerate(keys)}, step=0)
    jax.block_until_ready((loss0, lmbda0))
    ref_loss0, ref_lmbda0, ref_prev0 = _reference_softadapt(
        losses_step0, jnp.zeros((num_losses,), jnp.float32), 0,
        num_losses, 1e-8, agg.static_weights)
    assert jnp.allclose(loss0, ref_loss0, rtol=1e-5, atol=1e-6), (loss0, ref_loss0)
    assert jnp.allclose(lmbda0, ref_lmbda0, rtol=1e-5, atol=1e-6)
    # prev_losses is checked BEFORE step 1 overwrites the buffer (previous bug).
    assert jnp.allclose(agg.prev_losses, ref_prev0, rtol=1e-5, atol=1e-6)

    # --- step 1: adaptive weighting using prev_losses from step 0 ---
    loss1, lmbda1 = agg.forward({k: losses_step1[i] for i, k in enumerate(keys)}, step=1)
    jax.block_until_ready((loss1, lmbda1))
    ref_loss1, ref_lmbda1, ref_prev1 = _reference_softadapt(
        losses_step1, ref_prev0, 1, num_losses, 1e-8, agg.static_weights)
    assert jnp.allclose(loss1, ref_loss1, rtol=1e-5, atol=1e-6), (loss1, ref_loss1)
    assert jnp.allclose(lmbda1, ref_lmbda1, rtol=1e-5, atol=1e-6)
    assert jnp.allclose(agg.prev_losses, ref_prev1, rtol=1e-5, atol=1e-6)

    print("KERNEL_OK")
</pallas_src>

<mosaic_0001>
module attributes {stable_mosaic.version = 11 : i64} {
  func.func @_softadapt_kernel(%arg0: memref<1xi32, #tpu.memory_space<smem>>, %arg1: memref<4xf32, #tpu.memory_space<smem>>, %arg2: memref<1x128xf32, #tpu.memory_space<vmem>>, %arg3: memref<1x1xf32, #tpu.memory_space<vmem>>, %arg4: memref<1x128xf32, #tpu.memory_space<vmem>>, %arg5: memref<1x128xf32, #tpu.memory_space<vmem>>) attributes {dimension_semantics = [], scalar_prefetch = 0 : i64, scratch_operands = 0 : i64, tpu.core_type = #tpu.core_type<tc>} {
    %c0 = arith.constant 0 : index
    %0 = memref.load %arg0[%c0] : memref<1xi32, #tpu.memory_space<smem>>
    %c0_0 = arith.constant 0 : index
    %c0_1 = arith.constant 0 : index
    %1 = vector.load %arg2[%c0_0, %c0_1] : memref<1x128xf32, #tpu.memory_space<vmem>>, vector<1x128xf32>
    %2 = tpu.iota {dimensions = array<i32: 1>} : vector<1x128xi32>
    %c4_i32 = arith.constant 4 : i32
    %3 = vector.broadcast %c4_i32 : i32 to vector<1x128xi32>
    %4 = arith.cmpi slt, %2, %3 : vector<1x128xi32>
    %cst = arith.constant 0.000000e+00 : f32
    %5 = vector.broadcast %cst : f32 to vector<1x128xf32>
    %c0_i32 = arith.constant 0 : i32
    %6 = vector.broadcast %c0_i32 : i32 to vector<1x128xi32>
    %7 = arith.cmpi eq, %2, %6 : vector<1x128xi32>
    %c0_2 = arith.constant 0 : index
    %8 = memref.load %arg1[%c0_2] : memref<4xf32, #tpu.memory_space<smem>>
    %cst_3 = arith.constant 2.000000e+00 : f32
    %9 = arith.mulf %8, %cst_3 : f32
    %10 = vector.broadcast %9 : f32 to vector<1x128xf32>
    %11 = arith.select %7, %10, %5 : vector<1x128xi1>, vector<1x128xf32>
    %c1_i32 = arith.constant 1 : i32
    %12 = vector.broadcast %c1_i32 : i32 to vector<1x128xi32>
    %13 = arith.cmpi eq, %2, %12 : vector<1x128xi32>
    %c1 = arith.constant 1 : index
    %14 = memref.load %arg1[%c1] : memref<4xf32, #tpu.memory_space<smem>>
    %cst_4 = arith.constant 1.000000e+00 : f32
    %15 = arith.mulf %14, %cst_4 : f32
    %16 = vector.broadcast %15 : f32 to vector<1x128xf32>
    %17 = arith.select %13, %16, %11 : vector<1x128xi1>, vector<1x128xf32>
    %c2_i32 = arith.constant 2 : i32
    %18 = vector.broadcast %c2_i32 : i32 to vector<1x128xi32>
    %19 = arith.cmpi eq, %2, %18 : vector<1x128xi32>
    %c2 = arith.constant 2 : index
    %20 = memref.load %arg1[%c2] : memref<4xf32, #tpu.memory_space<smem>>
    %cst_5 = arith.constant 1.000000e+00 : f32
    %21 = arith.mulf %20, %cst_5 : f32
    %22 = vector.broadcast %21 : f32 to vector<1x128xf32>
    %23 = arith.select %19, %22, %17 : vector<1x128xi1>, vector<1x128xf32>
    %c3_i32 = arith.constant 3 : i32
    %24 = vector.broadcast %c3_i32 : i32 to vector<1x128xi32>
    %25 = arith.cmpi eq, %2, %24 : vector<1x128xi32>
    %c3 = arith.constant 3 : index
    %26 = memref.load %arg1[%c3] : memref<4xf32, #tpu.memory_space<smem>>
    %cst_6 = arith.constant 1.000000e+00 : f32
    %27 = arith.mulf %26, %cst_6 : f32
    %28 = vector.broadcast %27 : f32 to vector<1x128xf32>
    %29 = arith.select %25, %28, %23 : vector<1x128xi1>, vector<1x128xf32>
    %c0_i32_7 = arith.constant 0 : i32
    %30 = arith.cmpi eq, %0, %c0_i32_7 : i32
    %31 = arith.extui %30 : i1 to i32
    %c0_i32_8 = arith.constant 0 : i32
    %32 = arith.cmpi ne, %31, %c0_i32_8 : i32
    scf.if %32 {
      %cst_13 = arith.constant dense<0.000000e+00> : vector<1xf32>
      %37 = vector.multi_reduction <add>, %29, %cst_13 [1] : vector<1x128xf32> to vector<1xf32>
      %38 = vector.shape_cast %37 : vector<1xf32> to vector<1x1xf32>
      %c0_14 = arith.constant 0 : index
      %c0_15 = arith.constant 0 : index
      %39 = vector.load %arg3[%c0_14, %c0_15] : memref<1x1xf32, #tpu.memory_space<vmem>>, vector<1x1xf32>
      tpu.vector_store %arg3[%c0_14, %c0_15], %38 {strides = array<i32>} : memref<1x1xf32, #tpu.memory_space<vmem>>, vector<1x1xf32>,
      %40 = arith.extui %4 : vector<1x128xi1> to vector<1x128xi32>
      %41 = arith.sitofp %40 : vector<1x128xi32> to vector<1x128xf32>
      %c0_16 = arith.constant 0 : index
      %c0_17 = arith.constant 0 : index
      %42 = vector.load %arg4[%c0_16, %c0_17] : memref<1x128xf32, #tpu.memory_space<vmem>>, vector<1x128xf32>
      tpu.vector_store %arg4[%c0_16, %c0_17], %41 {strides = array<i32>} : memref<1x128xf32, #tpu.memory_space<vmem>>, vector<1x128xf32>,
    } else {
    }
    %c0_i32_9 = arith.constant 0 : i32
    %33 = arith.cmpi ne, %0, %c0_i32_9 : i32
    %34 = arith.extui %33 : i1 to i32
    %c0_i32_10 = arith.constant 0 : i32
    %35 = arith.cmpi ne, %34, %c0_i32_10 : i32
    scf.if %35 {
      %37 = arith.divf %29, %1 : vector<1x128xf32>
      %cst_13 = arith.constant 0xFF800000 : f32
      %38 = vector.broadcast %cst_13 : f32 to vector<1x128xf32>
      %39 = arith.select %4, %37, %38 : vector<1x128xi1>, vector<1x128xf32>
      %40 = vector.shape_cast %39 : vector<1x128xf32> to vector<1x1x128xf32>
      %cst_14 = arith.constant dense<0xFF800000> : vector<1xf32>
      %41 = vector.multi_reduction <maximumf>, %40, %cst_14 [1, 2] : vector<1x1x128xf32> to vector<1xf32>
      %42 = vector.shape_cast %41 : vector<1xf32> to vector<1x1x1xf32>
      %43 = vector.extract %42[0, 0, 0] : f32 from vector<1x1x1xf32>
      %cst_15 = arith.constant 9.99999993E-9 : f32
      %44 = vector.broadcast %cst_15 : f32 to vector<1x128xf32>
      %45 = arith.addf %1, %44 : vector<1x128xf32>
      %46 = tpu.reciprocal %45 {approx = true} : vector<1x128xf32> -> vector<1x128xf32>
      %47 = arith.mulf %45, %46 : vector<1x128xf32>
      %cst_16 = arith.constant 2.000000e+00 : f32
      %48 = vector.broadcast %cst_16 : f32 to vector<1x128xf32>
      %49 = arith.subf %48, %47 : vector<1x128xf32>
      %50 = arith.mulf %46, %49 : vector<1x128xf32>
      %51 = arith.mulf %45, %50 : vector<1x128xf32>
      %cst_17 = arith.constant 2.000000e+00 : f32
      %52 = vector.broadcast %cst_17 : f32 to vector<1x128xf32>
      %53 = arith.subf %52, %51 : vector<1x128xf32>
      %54 = arith.mulf %50, %53 : vector<1x128xf32>
      %55 = arith.mulf %29, %54 : vector<1x128xf32>
      %56 = vector.broadcast %43 : f32 to vector<1x128xf32>
      %57 = arith.subf %55, %56 : vector<1x128xf32>
      %58 = math.exp %57 : vector<1x128xf32>
      %cst_18 = arith.constant 0.000000e+00 : f32
      %59 = vector.broadcast %cst_18 : f32 to vector<1x128xf32>
      %60 = arith.select %4, %58, %59 : vector<1x128xi1>, vector<1x128xf32>
      %c0_19 = arith.constant 0 : index
      %c0_20 = arith.constant 0 : index
      %61 = vector.load %arg4[%c0_19, %c0_20] : memref<1x128xf32, #tpu.memory_space<vmem>>, vector<1x128xf32>
      tpu.vector_store %arg4[%c0_19, %c0_20], %60 {strides = array<i32>} : memref<1x128xf32, #tpu.memory_space<vmem>>, vector<1x128xf32>,
      %62 = arith.mulf %60, %29 : vector<1x128xf32>
      %63 = tpu.concatenate %60, %62 in 0 : vector<1x128xf32>, vector<1x128xf32> -> vector<2x128xf32>
      %cst_21 = arith.constant dense<0.000000e+00> : vector<2xf32>
      %64 = vector.multi_reduction <add>, %63, %cst_21 [1] : vector<2x128xf32> to vector<2xf32>
      %65 = vector.shape_cast %64 : vector<2xf32> to vector<2x1xf32>
      %66 = vector.extract_strided_slice %65 {offsets = [0, 0], sizes = [1, 1], strides = [1, 1]} : vector<2x1xf32> to vector<1x1xf32>
      %67 = vector.extract_strided_slice %65 {offsets = [1, 0], sizes = [1, 1], strides = [1, 1]} : vector<2x1xf32> to vector<1x1xf32>
      %cst_22 = arith.constant 9.99999993E-9 : f32
      %68 = vector.broadcast %cst_22 : f32 to vector<1x1xf32>
      %69 = arith.addf %66, %68 : vector<1x1xf32>
      %70 = tpu.reciprocal %69 {approx = true} : vector<1x1xf32> -> vector<1x1xf32>
      %71 = arith.mulf %69, %70 : vector<1x1xf32>
      %cst_23 = arith.constant 2.000000e+00 : f32
      %72 = vector.broadcast %cst_23 : f32 to vector<1x1xf32>
      %73 = arith.subf %72, %71 : vector<1x1xf32>
      %74 = arith.mulf %70, %73 : vector<1x1xf32>
      %75 = arith.mulf %69, %74 : vector<1x1xf32>
      %cst_24 = arith.constant 2.000000e+00 : f32
      %76 = vector.broadcast %cst_24 : f32 to vector<1x1xf32>
      %77 = arith.subf %76, %75 : vector<1x1xf32>
      %78 = arith.mulf %74, %77 : vector<1x1xf32>
      %cst_25 = arith.constant 4.000000e+00 : f32
      %79 = vector.broadcast %cst_25 : f32 to vector<1x1xf32>
      %80 = arith.mulf %79, %78 : vector<1x1xf32>
      %81 = arith.mulf %67, %80 : vector<1x1xf32>
      %c0_26 = arith.constant 0 : index
      %c0_27 = arith.constant 0 : index
      %82 = vector.load %arg3[%c0_26, %c0_27] : memref<1x1xf32, #tpu.memory_space<vmem>>, vector<1x1xf32>
      tpu.vector_store %arg3[%c0_26, %c0_27], %81 {strides = array<i32>} : memref<1x1xf32, #tpu.memory_space<vmem>>, vector<1x1xf32>,
    } else {
    }
    %c0_11 = arith.constant 0 : index
    %c0_12 = arith.constant 0 : index
    %36 = vector.load %arg5[%c0_11, %c0_12] : memref<1x128xf32, #tpu.memory_space<vmem>>, vector<1x128xf32>
    tpu.vector_store %arg5[%c0_11, %c0_12], %29 {strides = array<i32>} : memref<1x128xf32, #tpu.memory_space<vmem>>, vector<1x128xf32>,
    return
  }
}

</mosaic_0001>

<bundles_post_ra>
// kernel: fwd.1
= control target key start
LH: loop header
LB: loop body
LE: loop exit
PB: predicated region body
PF: predicated region fallthrough
CT: control target
= control target key end

     0   :  { %12 = vsyncpa [#allocation5], 0  ;;  %s270_s0 = inlined_call_operand.<no memory space> [shape: s32[1], index: 0, kind: input, shape index: {}]   ;;  %s271_s1 = inlined_call_operand.vmem [shape: f32[4], index: 1, kind: input, shape index: {}]   ;;  %s272_s2 = inlined_call_operand.vmem [shape: f32[1,128], index: 2, kind: input, shape index: {}, may-alias: {2,5}]   ;;  %s273_s3 = inlined_call_operand.hbm [shape: f32[1,1], index: 3, kind: output, shape index: {0}]   ;;  %s274_s4 = inlined_call_operand.vmem [shape: f32[1,128], index: 4, kind: output, shape index: {1}]   ;;  %s275_s5 = inlined_call_operand.vmem [shape: f32[1,128], index: 5, kind: output, shape index: {2}, may-alias: {2,5}]  }
   0x1   :  { %13 = vsyncpa [#allocation4], 0  ;;  %s22_s20 = sshll.u32 %s271_s1, 4  ;;  %s23_s20 = int_to_ptr.vmem [resolvable:$true] %s22_s20 }
   0x2   :  { %s165_s21 = scalar_lea.vmem %s23_s20, 16  ;;  %p170_p1 = scmp.lt.s32.totalorder %s23_s20, %s23_s20 }
   0x3   :  { %p166_p0 = scmp.ne.s32.totalorder %s23_s20, %s165_s21  ;;  %p171_p2 = scmp.lt.s32.totalorder %s165_s21, %s165_s21 }
   0x5   :  { %p172_p3 = por %p171_p2, %p170_p1 }
   0x7   :  { %p173_p4 = pnand %p172_p3, %p166_p0 }
   0x9   :  { %176 = shalt.err (!%p173_p4)
}
   0xa   :  { %s201_s22 = smov [#allocation3]  }
   0xb   :  { %25 = dma.vmem_to_smem %s23_s20, 16, %s201_s22, [#allocation5]  }
   0xc   :  { %197 = dma.done.wait [#allocation5], 16  }
   0xd   :  { %198 = vsyncadd [#allocation5], 4294967280 }
   0xe   :  { %31 = sfence }
   0xf   :  { %v33_v0 = vld [vmem:[%s272_s2] sm:$0x1]  ;;  %v34_v1 = vlaneseq  ;;  %s38_s25 = sld [smem:[#allocation3]]  ;;  %p149_p5 = scmp.ne.s32.totalorder %s270_s0, 0 }
  0x10   :  { %s146_s1 = sld [smem:[#allocation3 + $0x1]] }
  0x11   :  { %v35_v2 = vand.u32 127, %v34_v1  ;;  %s147_s26 = sld [smem:[#allocation3 + $0x2]] }
  0x12   :  { %s148_s27 = sld [smem:[#allocation3 + $0x3]] }
  0x13   :  { %vm36_vm0 = vcmp.lt.s32.totalorder %v35_v2, 4  ;;  %vm37_vm1 = vcmp.eq.s32.totalorder %v35_v2, 0  ;;  %vm42_vm2 = vcmp.eq.s32.totalorder %v35_v2, 1  ;;  %vm46_vm3 = vcmp.eq.s32.totalorder %v35_v2, 2 }
  0x14   :  { %vm50_vm4 = vcmp.eq.s32.totalorder %v35_v2, 3 }
  0x15   :  { %s39_s28 = smul.f32 2.0, %s38_s25 }
  0x16   :  { %v44_v3 = vstv %s146_s1 }
  0x17   :  { %v40_v4 = vstv %s39_s28  ;;  %v48_v5 = vstv %s147_s26  ;;  %57 = sbr.rel (%p149_p5) target bundleno = 167 (0xa7), region = 21 }
  0x18   :  { %v41_v6 = vsel %vm37_vm1, %v40_v4, 0.0  ;;  %v52_v7 = vstv %s148_s27 }
  0x19   :  { %v45_v8 = vsel %vm42_vm2, %v44_v3, %v41_v6 }
  0x1a   :  { %v49_v9 = vsel %vm46_vm3, %v48_v5, %v45_v8 }
  0x1b   :  { %v240_v10 = vsel %vm50_vm4, %v52_v7, %v49_v9 }
  0x1c   :  { %58 = vadd.xlane.f32.xlu0 %v240_v10  ;;  %v202_v11 = vmov 0.0   ;;  %vm60_vm5 = vcmask 0  }
  0x1d   :  { %v150_v12 = vsel %vm36_vm0, 1.0, %v202_v11 }
  0x1e   :  { %64 = vst [vmem:[%s274_s4] sm:$0x1] %v150_v12 }
  0xa5   :  { %v59_v13 = vpop.xlane.xlu0 %58 }
  0xa6   :  { %61 = vst.msk [vmem:[#allocation6] sm:$0x1] %vm60_vm5, %v59_v13 }
  0xa7 PF:  { %p151_p6 = scmp.eq.s32.totalorder %s270_s0, 0 }
  0xa9   :  { %68 = sbr.rel (%p151_p6) target bundleno = 591 (0x24f), region = 25 }
  0xae   :  { %157 = vrcp.f32 %v33_v0  ;;  %vm72_vm6 = vcmask 1040384   ;;  %v83_v25 = vadd.f32 1e-08, %v33_v0  ;;  %vm103_vm7 = vcmask 1041408  }
  0xaf   :  { %vm120_vm8 = vcmask 1025  }
  0xb0   :  { %159 = vrcp.f32 %v83_v25 }
  0xbb   :  { %v158_v14 = vpop.eup %157 }
  0xbc   :  { %v70_v15 = vmul.f32 %v158_v14, %v240_v10 }
  0xbd   :  { %v160_v26 = vpop.eup %159 }
  0xbe   :  { %v71_v16 = vsel %vm36_vm0, %v70_v15, -inf  ;;  %v85_v27 = vmul.f32 %v160_v26, %v83_v25 }
  0xbf   :  { %v73_v17 = vsel %vm72_vm6, %v71_v16, -inf }
  0xc0   :  { %74 = vmax.xlane.f32.xlu0 %v73_v17  ;;  %v86_v28 = vsub.f32 2.0, %v85_v27 }
  0xc2   :  { %v87_v29 = vmul.f32 %v160_v26, %v86_v28 }
  0xc4   :  { %v88_v30 = vmul.f32 %v87_v29, %v83_v25 }
  0xc6   :  { %v89_v31 = vsub.f32 2.0, %v88_v30 }
  0xc8   :  { %v90_v32 = vmul.f32 %v89_v31, %v87_v29 }
  0xca   :  { %v91_v33 = vmul.f32 %v90_v32, %v240_v10 }
 0x149   :  { %v75_v18 = vpop.xlane.xlu0 %74 }
 0x14a   :  { %v76_v19 = vrot.slane %v75_v18, 4 }
 0x14c   :  { %v77_v20 = vmax.f32 %v75_v18, %v76_v19 }
 0x14e   :  { %v78_v21 = vrot.slane %v77_v20, 2 }
 0x150   :  { %v79_v22 = vmax.f32 %v77_v20, %v78_v21 }
 0x152   :  { %v80_v23 = vrot.slane %v79_v22, 1 }
 0x154   :  { %v81_v24 = vmax.f32 %v79_v22, %v80_v23 }
 0x156   :  { %152 = vpush %v81_v24 }
 0x187   :  { %s153_s0 = spop %152 }
 0x188   :  { %v92_v34 = vstv %s153_s0 }
 0x189   :  { %v93_v35 = vsub.f32 %v91_v33, %v92_v34 }
 0x18b   :  { %v94_v36 = vmul.f32 1.442695, %v93_v35 }
 0x18d   :  { %161 = vpow2.f32 %v94_v36 }
 0x19a   :  { %v162_v37 = vpop.eup %161 }
 0x19b   :  { %v96_v38 = vsel %vm36_vm0, %v162_v37, 0.0 }
 0x19c   :  { %v98_v39 = vmul.f32 %v96_v38, %v240_v10  ;;  %97 = vst [vmem:[%s274_s4] sm:$0x1] %v96_v38 }
 0x19e   :  { %v100_v40 = vrot.slane %v98_v39, 7 }
 0x1a0   :  { %v102_v41 = vsel %vm72_vm6, %v96_v38, %v100_v40 }
 0x1a1   :  { %v104_v42 = vsel %vm103_vm7, %v102_v41, 0.0 }
 0x1a2   :  { %105 = vadd.xlane.f32.xlu0 %v104_v42 }
 0x22b   :  { %v106_v43 = vpop.xlane.xlu0 %105 }
 0x22c   :  { %v107_v44 = vadd.f32 1e-08, %v106_v43 }
 0x22e   :  { %163 = vrcp.f32 %v107_v44 }
 0x23b   :  { %v164_v45 = vpop.eup %163 }
 0x23c   :  { %v109_v46 = vmul.f32 %v164_v45, %v107_v44 }
 0x23e   :  { %v110_v47 = vsub.f32 2.0, %v109_v46 }
 0x240   :  { %v111_v48 = vmul.f32 %v164_v45, %v110_v47 }
 0x242   :  { %v112_v49 = vmul.f32 %v111_v48, %v107_v44 }
 0x244   :  { %v113_v50 = vsub.f32 2.0, %v112_v49 }
 0x246   :  { %v114_v51 = vmul.f32 %v113_v50, %v111_v48 }
 0x248   :  { %v115_v52 = vmul.f32 4.0, %v114_v51 }
 0x24a   :  { %v117_v53 = vrot.slane %v115_v52, 7 }
 0x24c   :  { %v119_v54 = vmul.f32 %v117_v53, %v106_v43 }
 0x24e   :  { %121 = vst.msk [vmem:[#allocation6 - $0x1] sm:$0x2] %vm120_vm8, %v119_v54 }
 0x24f PF:  { %122 = vst [vmem:[%s275_s5] sm:$0x1] %v240_v10  ;;  %s203_s12 = smov [#allocation6]  }
 0x250   :  { %s129_s13 = sshll.u32 %s203_s12, 4  ;;  %s130_s13 = int_to_ptr.vmem [resolvable:$true] %s129_s13 }
 0x251   :  { %s177_s14 = scalar_lea.vmem %s130_s13, 16  ;;  %s181_s15 = scalar_lea.vmem %s130_s13, 32 }
 0x252   :  { %p178_p7 = scmp.ne.s32.totalorder %s130_s13, %s177_s14  ;;  %p182_p8 = scmp.lt.s32.totalorder %s130_s13, %s130_s13 }
 0x253   :  { %p183_p9 = scmp.lt.s32.totalorder %s181_s15, %s177_s14 }
 0x255   :  { %p184_p10 = por %p183_p9, %p182_p8 }
 0x257   :  { %p185_p11 = pnand %p184_p10, %p178_p7 }
 0x259   :  { %188 = shalt.err (!%p185_p11)
}
 0x25a   :  { %132 = dma.vmem_to_hbm [thread:$0]  %s130_s13, 16, %s273_s3, [#allocation4]  }
 0x25b   :  { %199 = dma.done.wait [#allocation4], 16  }
 0x25c   :  { %200 = vsyncadd [#allocation4], 4294967280 }
 0x25d   :  { %144 = vsyncpa [#allocation4], 1 }
 0x25e   :  { %145 = vsyncpa [#allocation5], 1 }

</bundles_post_ra>
